<compile_context>
chip_gen: v5e
topology: v5e:2x2
jax: 0.10.0
libtpu: 0.0.40
codegen_flags: <defaults>
</compile_context>

<pallas_src>
import functools

import jax
import jax.numpy as jnp
from jax.experimental import pallas as pl
from jax.experimental.pallas import tpu as pltpu

BETA = 0.95
IS_HARD = 0   # unused in forward (kept for parity with the PyTorch module)
EPS = 1e-06   # defined in the module's __init__ but never used in forward


def _bootstrap_ce_kernel(logits_ref, labels_ref, out_ref, acc_row, *,
                         beta, n_valid, tile_n, need_mask):
    split = pl.program_id(0)                  # megacore split ("parallel")
    step = pl.program_id(1)                   # N-tile index ("arbitrary")
    num_splits = pl.num_programs(0)
    steps_per_split = pl.num_programs(1)

    @pl.when(step == 0)
    def _init():
        acc_row[...] = jnp.zeros_like(acc_row)

    x = logits_ref[...].astype(jnp.float32)   # (C, tn)
    y = labels_ref[...].astype(jnp.float32)   # (C, tn)

    # Numerically-stable log-softmax over axis 0 (the class axis).
    m = jnp.max(x, axis=0, keepdims=True)     # (1, tn)  XLU
    xm = x - m                                # (C, tn)  VPU
    e = jnp.exp(xm)                           # (C, tn)  EUP
    s = jnp.sum(e, axis=0, keepdims=True)     # (1, tn)  XLU
    log_p = xm - jnp.log(s)                   # (C, tn)  VPU (+ row log on EUP)

    # Per-column loss contribution, reduced over C before it ever hits VMEM:
    #   sum_c[(b*y + (1-b)*e/s) * log_p]
    #     = b * sum_c(y*log_p) + (1-b) * (1/s) * sum_c(e*log_p)
    # (`probs` is never materialized as a (C, tn) block.)
    row_y = jnp.sum(y * log_p, axis=0, keepdims=True)      # (1, tn)  XLU
    row_e = jnp.sum(e * log_p, axis=0, keepdims=True)      # (1, tn)  XLU
    inv_s = pl.reciprocal(s, approx=True)                  # (1, tn)  EUP slot
    row = beta * row_y + (1.0 - beta) * (row_e * inv_s)    # (1, tn)  VPU

    if need_mask:
        # Only the globally-last tile straddles N; every other tile does a
        # plain unmasked accumulate.  jnp.where (not a multiply) selects away
        # any NaN/Inf produced by the unspecified out-of-bounds columns.
        is_boundary = jnp.logical_and(split == num_splits - 1,
                                      step == steps_per_split - 1)

        @pl.when(is_boundary)
        def _acc_masked():
            col = ((split * steps_per_split + step) * tile_n
                   + jax.lax.broadcasted_iota(jnp.int32, (1, tile_n), 1))
            acc_row[...] += jnp.where(col < n_valid, row, 0.0)

        @pl.when(jnp.logical_not(is_boundary))
        def _acc():
            acc_row[...] += row
    else:
        acc_row[...] += row

    @pl.when(step == steps_per_split - 1)
    def _finalize():
        # One cross-lane reduce per split; write a lane-dense (8, 128) slab.
        partial = -jnp.sum(acc_row[...])
        out_ref[...] = jnp.full(out_ref.shape, partial, dtype=jnp.float32)


def _default_num_splits():
    # Use both TensorCores on multi-TC parts (v7x); a split axis is pure
    # overhead on single-TC chips (v5e / v6e).
    try:
        kind = jax.devices()[0].device_kind.lower()
        if "v7" in kind:
            return 2
    except Exception:
        pass
    return 1


def per_bootstrap_cross_entropy(logits, labels, *, beta=BETA, num_splits=None,
                                target_step_bytes=2 * 1024 * 1024,
                                buffer_count=2):
    """Bootstrap cross-entropy.  logits, labels: [C, N]; returns scalar f32.

    Softmax is over axis 0, matching torch.softmax(logits, 0).  Any float
    dtype works (upcast to f32 in-kernel); passing bf16 logits/labels halves
    HBM traffic for this memory-bound kernel.
    """
    assert logits.shape == labels.shape and logits.ndim == 2
    C, N = logits.shape

    if num_splits is None:
        num_splits = _default_num_splits()

    # ---- VMEM budget / limit, derived from the actual chip -----------------
    try:
        vmem_cap = int(pltpu.get_tpu_info().vmem_capacity_bytes)
    except Exception:
        vmem_cap = 64 * 1024 * 1024          # conservative (v7x per-core size)
    vmem_budget = min(vmem_cap // 2, 48 * 1024 * 1024)    # for tile sizing
    vmem_limit = min(vmem_cap * 3 // 4, 96 * 1024 * 1024)

    # ---- tile width: ~target_step_bytes of input DMA per grid step ---------
    in_bytes_per_col = C * (logits.dtype.itemsize + labels.dtype.itemsize)
    tn = pl.cdiv(target_step_bytes, in_bytes_per_col)
    # VMEM footprint per column: 2 pipeline buffers of both inputs plus ~6
    # (C, tn) f32 in-kernel temporaries (x, y, e, log_p and the two products).
    vmem_per_col = 2 * in_bytes_per_col + 6 * C * 4
    tn = min(tn, max(vmem_budget // vmem_per_col, 128))
    tn = max(512, (tn // 512) * 512)                       # lane-dense chunks
    per_split = pl.cdiv(N, num_splits)
    tn = min(tn, pl.cdiv(per_split, 128) * 128)            # don't overshoot N
    tn = max(tn, 128)

    n_tiles = pl.cdiv(N, tn)
    if num_splits > 1 and n_tiles % num_splits != 0:
        num_splits = 1                   # only split when tiles divide evenly
    steps_per_split = n_tiles // num_splits
    need_mask = (N % tn) != 0            # only the last tile can be partial

    kernel = functools.partial(
        _bootstrap_ce_kernel, beta=float(beta), n_valid=N, tile_n=tn,
        need_mask=need_mask)

    def in_index_map(c, i):
        return (0, c * steps_per_split + i)

    if buffer_count != 2:
        in_spec = pl.BlockSpec((C, tn), in_index_map,
                               pipeline_mode=pl.Buffered(buffer_count))
    else:
        in_spec = pl.BlockSpec((C, tn), in_index_map)
    out_spec = pl.BlockSpec((8, 128), lambda c, i: (c, 0))

    cost = pl.CostEstimate(
        flops=int(8 * C * N),
        transcendentals=int(C * N + 2 * N),
        bytes_accessed=int(C * N * (logits.dtype.itemsize
                                    + labels.dtype.itemsize)
                           + num_splits * 8 * 128 * 4),
    )

    partials = pl.pallas_call(
        kernel,
        out_shape=jax.ShapeDtypeStruct((num_splits * 8, 128), jnp.float32),
        grid_spec=pltpu.PrefetchScalarGridSpec(
            num_scalar_prefetch=0,
            grid=(num_splits, steps_per_split),
            in_specs=[in_spec, in_spec],
            out_specs=out_spec,
            scratch_shapes=[pltpu.VMEM((1, tn), jnp.float32)],
        ),
        compiler_params=pltpu.CompilerParams(
            dimension_semantics=("parallel", "arbitrary"),
            vmem_limit_bytes=int(vmem_limit),
        ),
        cost_estimate=cost,
    )(logits, labels)

    # Each split's partial loss is replicated across its (8, 128) slab.
    return jnp.sum(partials[::8, 0])


def _reference(logits, labels, beta=BETA):
    probs = jax.nn.softmax(logits.astype(jnp.float32), axis=0)
    return -jnp.sum((beta * labels + (1.0 - beta) * probs) * jnp.log(probs))


if __name__ == "__main__":
    key = jax.random.PRNGKey(0)
    k1, k2, k3, k4 = jax.random.split(key, 4)

    # Case 1: C=8 classes over a flattened (batch=2, H=16, W=32) field, N=1024.
    C1, N1 = 8, 2 * 16 * 32
    logits1 = jax.random.normal(k1, (C1, N1), dtype=jnp.float32)
    labels1 = jax.nn.softmax(
        jax.random.normal(k2, (C1, N1), dtype=jnp.float32), axis=0)
    loss1 = per_bootstrap_cross_entropy(logits1, labels1)
    jax.block_until_ready(loss1)
    ref1 = _reference(logits1, labels1)
    assert jnp.allclose(loss1, ref1, rtol=1e-3, atol=1e-3), (loss1, ref1)

    # Case 2: ragged N (not a multiple of 128) — exercises the in-kernel
    # boundary-tile masking (no wrapper-side padding pass anymore).
    C2, N2 = 4, 2 * 16 * 21   # N = 672
    logits2 = jax.random.normal(k3, (C2, N2), dtype=jnp.float32)
    labels2 = jax.nn.softmax(
        jax.random.normal(k4, (C2, N2), dtype=jnp.float32), axis=0)
    loss2 = per_bootstrap_cross_entropy(logits2, labels2)
    jax.block_until_ready(loss2)
    ref2 = _reference(logits2, labels2)
    assert jnp.allclose(loss2, ref2, rtol=1e-3, atol=1e-3), (loss2, ref2)

    print("KERNEL_OK")
</pallas_src>

<mosaic_0001>
module attributes {stable_mosaic.version = 11 : i64} {
  func.func @_bootstrap_ce_kernel(%arg0: i32, %arg1: i32, %arg2: memref<8x1024xf32, #tpu.memory_space<vmem>>, %arg3: memref<8x1024xf32, #tpu.memory_space<vmem>>, %arg4: memref<8x128xf32, #tpu.memory_space<vmem>>, %arg5: memref<1x1024xf32, #tpu.memory_space<vmem>>) attributes {dimension_semantics = [#tpu.dimension_semantics<parallel>, #tpu.dimension_semantics<arbitrary>], iteration_bounds = array<i64: 1, 1>, scalar_prefetch = 0 : i64, scratch_operands = 1 : i64, tpu.core_type = #tpu.core_type<tc>, window_params = [{transform_indices = @transform_0, window_bounds = array<i64: 8, 1024>}, {transform_indices = @transform_1, window_bounds = array<i64: 8, 1024>}, {transform_indices = @transform_2, window_bounds = array<i64: 8, 128>}]} {
    %c0_i32 = arith.constant 0 : i32
    %0 = arith.cmpi eq, %arg1, %c0_i32 : i32
    %1 = arith.extui %0 : i1 to i32
    %c0_i32_0 = arith.constant 0 : i32
    %2 = arith.cmpi ne, %1, %c0_i32_0 : i32
    scf.if %2 {
      %cst_15 = arith.constant 0.000000e+00 : f32
      %34 = vector.broadcast %cst_15 : f32 to vector<1x1024xf32>
      %c0_16 = arith.constant 0 : index
      %c0_17 = arith.constant 0 : index
      %35 = vector.load %arg5[%c0_16, %c0_17] : memref<1x1024xf32, #tpu.memory_space<vmem>>, vector<1x1024xf32>
      tpu.vector_store %arg5[%c0_16, %c0_17], %34 {strides = array<i32>} : memref<1x1024xf32, #tpu.memory_space<vmem>>, vector<1x1024xf32>,
    } else {
    }
    %c0 = arith.constant 0 : index
    %c0_1 = arith.constant 0 : index
    %3 = vector.load %arg2[%c0, %c0_1] : memref<8x1024xf32, #tpu.memory_space<vmem>>, vector<8x1024xf32>
    %c0_2 = arith.constant 0 : index
    %c0_3 = arith.constant 0 : index
    %4 = vector.load %arg3[%c0_2, %c0_3] : memref<8x1024xf32, #tpu.memory_space<vmem>>, vector<8x1024xf32>
    %cst = arith.constant dense<0xFF800000> : vector<1024xf32>
    %5 = vector.multi_reduction <maximumf>, %3, %cst [0] : vector<8x1024xf32> to vector<1024xf32>
    %6 = vector.shape_cast %5 : vector<1024xf32> to vector<1x1024xf32>
    %7 = vector.broadcast %6 : vector<1x1024xf32> to vector<8x1024xf32>
    %8 = arith.subf %3, %7 : vector<8x1024xf32>
    %9 = math.exp %8 : vector<8x1024xf32>
    %cst_4 = arith.constant dense<0.000000e+00> : vector<1024xf32>
    %10 = vector.multi_reduction <add>, %9, %cst_4 [0] : vector<8x1024xf32> to vector<1024xf32>
    %11 = vector.shape_cast %10 : vector<1024xf32> to vector<1x1024xf32>
    %12 = math.log %11 : vector<1x1024xf32>
    %13 = vector.broadcast %12 : vector<1x1024xf32> to vector<8x1024xf32>
    %14 = arith.subf %8, %13 : vector<8x1024xf32>
    %15 = arith.mulf %4, %14 : vector<8x1024xf32>
    %cst_5 = arith.constant dense<0.000000e+00> : vector<1024xf32>
    %16 = vector.multi_reduction <add>, %15, %cst_5 [0] : vector<8x1024xf32> to vector<1024xf32>
    %17 = vector.shape_cast %16 : vector<1024xf32> to vector<1x1024xf32>
    %18 = arith.mulf %9, %14 : vector<8x1024xf32>
    %cst_6 = arith.constant dense<0.000000e+00> : vector<1024xf32>
    %19 = vector.multi_reduction <add>, %18, %cst_6 [0] : vector<8x1024xf32> to vector<1024xf32>
    %20 = vector.shape_cast %19 : vector<1024xf32> to vector<1x1024xf32>
    %21 = tpu.reciprocal %11 {approx = true} : vector<1x1024xf32> -> vector<1x1024xf32>
    %cst_7 = arith.constant 0.949999988 : f32
    %22 = vector.broadcast %cst_7 : f32 to vector<1x1024xf32>
    %23 = arith.mulf %22, %17 : vector<1x1024xf32>
    %24 = arith.mulf %20, %21 : vector<1x1024xf32>
    %cst_8 = arith.constant 5.000000e-02 : f32
    %25 = vector.broadcast %cst_8 : f32 to vector<1x1024xf32>
    %26 = arith.mulf %25, %24 : vector<1x1024xf32>
    %27 = arith.addf %23, %26 : vector<1x1024xf32>
    %c0_9 = arith.constant 0 : index
    %c0_10 = arith.constant 0 : index
    %28 = vector.load %arg5[%c0_9, %c0_10] : memref<1x1024xf32, #tpu.memory_space<vmem>>, vector<1x1024xf32>
    %29 = arith.addf %28, %27 : vector<1x1024xf32>
    %c0_11 = arith.constant 0 : index
    %c0_12 = arith.constant 0 : index
    %30 = vector.load %arg5[%c0_11, %c0_12] : memref<1x1024xf32, #tpu.memory_space<vmem>>, vector<1x1024xf32>
    tpu.vector_store %arg5[%c0_11, %c0_12], %29 {strides = array<i32>} : memref<1x1024xf32, #tpu.memory_space<vmem>>, vector<1x1024xf32>,
    %c0_i32_13 = arith.constant 0 : i32
    %31 = arith.cmpi eq, %arg1, %c0_i32_13 : i32
    %32 = arith.extui %31 : i1 to i32
    %c0_i32_14 = arith.constant 0 : i32
    %33 = arith.cmpi ne, %32, %c0_i32_14 : i32
    scf.if %33 {
      %c0_15 = arith.constant 0 : index
      %c0_16 = arith.constant 0 : index
      %34 = vector.load %arg5[%c0_15, %c0_16] : memref<1x1024xf32, #tpu.memory_space<vmem>>, vector<1x1024xf32>
      %35 = vector.shape_cast %34 : vector<1x1024xf32> to vector<1x1x1024xf32>
      %cst_17 = arith.constant dense<0.000000e+00> : vector<1xf32>
      %36 = vector.multi_reduction <add>, %35, %cst_17 [1, 2] : vector<1x1x1024xf32> to vector<1xf32>
      %37 = vector.shape_cast %36 : vector<1xf32> to vector<1x1x1xf32>
      %38 = vector.extract %37[0, 0, 0] : f32 from vector<1x1x1xf32>
      %cst_18 = arith.constant 0.000000e+00 : f32
      %39 = arith.subf %cst_18, %38 : f32
      %40 = vector.broadcast %39 : f32 to vector<8x128xf32>
      %c0_19 = arith.constant 0 : index
      %c0_20 = arith.constant 0 : index
      %41 = vector.load %arg4[%c0_19, %c0_20] : memref<8x128xf32, #tpu.memory_space<vmem>>, vector<8x128xf32>
      tpu.vector_store %arg4[%c0_19, %c0_20], %40 {strides = array<i32>} : memref<8x128xf32, #tpu.memory_space<vmem>>, vector<8x128xf32>,
    } else {
    }
    return
  }
  func.func @transform_0(%arg0: i32, %arg1: i32) -> (i32, i32) {
    %c1_i32 = arith.constant 1 : i32
    %0 = arith.muli %arg0, %c1_i32 : i32
    %1 = arith.addi %0, %arg1 : i32
    %c0_i32 = arith.constant 0 : i32
    %c0_i32_0 = arith.constant 0 : i32
    return %c0_i32, %1 : i32, i32
  }
  func.func @transform_1(%arg0: i32, %arg1: i32) -> (i32, i32) {
    %c1_i32 = arith.constant 1 : i32
    %0 = arith.muli %arg0, %c1_i32 : i32
    %1 = arith.addi %0, %arg1 : i32
    %c0_i32 = arith.constant 0 : i32
    %c0_i32_0 = arith.constant 0 : i32
    return %c0_i32, %1 : i32, i32
  }
  func.func @transform_2(%arg0: i32, %arg1: i32) -> (i32, i32) {
    %c0_i32 = arith.constant 0 : i32
    %c0_i32_0 = arith.constant 0 : i32
    return %arg0, %c0_i32 : i32, i32
  }
}

</mosaic_0001>

<bundles_post_ra>
// kernel: tpu_custom_call.1
= control target key start
LH: loop header
LB: loop body
LE: loop exit
PB: predicated region body
PF: predicated region fallthrough
CT: control target
= control target key end

     0   :  { %7 = vsyncpa [#allocation4], 0  ;;  %s763_s0 = inlined_call_operand.hbm [shape: f32[8,1024], index: 0, kind: input, shape index: {}]   ;;  %s764_s1 = inlined_call_operand.hbm [shape: f32[8,1024], index: 1, kind: input, shape index: {}]   ;;  %s765_s2 = inlined_call_operand.hbm [shape: f32[8,128], index: 2, kind: output, shape index: {}]  }
   0x1   :  { %8 = vsyncpa [#allocation7], 0 }
   0x2   :  { %9 = vsyncpa [#allocation5], 0  ;;  %s19_s11 = sshll.u32 %s763_s0, 4  ;;  %s599_s12 = smov [#allocation3]   ;;  %s20_s11 = int_to_ptr.hbm [resolvable:$true] %s19_s11 }
   0x3   :  { %s21_s13 = sshll.u32 %s599_s12, 4  ;;  %s34_s16 = sshll.u32 %s764_s1, 4  ;;  %s22_s13 = int_to_ptr.vmem [resolvable:$true] %s21_s13  ;;  %s35_s16 = int_to_ptr.hbm [resolvable:$true] %s34_s16 }
   0x4   :  { %24 = dma.hbm_to_vmem [thread:$0]  %s20_s11, 1024, %s22_s13, [#allocation4]  }
   0x5   :  { %s600_s17 = smov [#allocation6]  }
   0x6   :  { %s36_s18 = sshll.u32 %s600_s17, 4  ;;  %s37_s18 = int_to_ptr.vmem [resolvable:$true] %s36_s18 }
   0x7   :  { %39 = dma.hbm_to_vmem [thread:$0]  %s35_s16, 1024, %s37_s18, [#allocation7]  }
   0x8   :  { %593 = dma.done.wait [#allocation4], 1024  }
   0x9   :  { %594 = vsyncadd [#allocation4], 4294966272 }
   0xa   :  { %595 = dma.done.wait [#allocation7], 1024  }
   0xb   :  { %596 = vsyncadd [#allocation7], 4294966272  ;;  %v57_v0 = vld [vmem:[#allocation3] sm:$0xff]  ;;  %v58_v1 = vld [vmem:[#allocation3 + $0x8] sm:$0xff]  ;;  %vm385_vm0 = vcmask 1040384   ;;  %vm387_vm1 = vcmask 1042434  }
   0xc   :  { %v59_v2 = vld [vmem:[#allocation3 + $0x10] sm:$0xff]  ;;  %v60_v3 = vld [vmem:[#allocation3 + $0x18] sm:$0xff]  ;;  %v61_v4 = vld [vmem:[#allocation3 + $0x20] sm:$0xff]  ;;  %v73_v6 = vrot.slane %v57_v0, 4  ;;  %v79_v7 = vrot.slane %v58_v1, 4  ;;  %vm389_vm2 = vcmask 1041408  }
   0xd   :  { %v62_v5 = vld [vmem:[#allocation3 + $0x28] sm:$0xff]  ;;  %v85_v8 = vrot.slane %v59_v2, 4  ;;  %v63_v9 = vld [vmem:[#allocation3 + $0x30] sm:$0xff]  ;;  %v64_v10 = vld [vmem:[#allocation3 + $0x38] sm:$0xff]  ;;  %v91_v11 = vrot.slane %v60_v3, 4  ;;  %v97_v12 = vrot.slane %v61_v4, 4 }
   0xe   :  { %v103_v13 = vrot.slane %v62_v5, 4  ;;  %v74_v14 = vmax.f32 %v57_v0, %v73_v6  ;;  %v80_v15 = vmax.f32 %v58_v1, %v79_v7  ;;  %v109_v17 = vrot.slane %v63_v9, 4  ;;  %s601_s0 = smov [#allocation8]   ;;  %s457_s21 = sshll.u32 %s765_s2, 4  ;;  %s458_s21 = int_to_ptr.hbm [resolvable:$true] %s457_s21 }
   0xf   :  { %v86_v16 = vmax.f32 %v59_v2, %v85_v8  ;;  %v92_v18 = vmax.f32 %v60_v3, %v91_v11  ;;  %v98_v19 = vmax.f32 %v61_v4, %v97_v12  ;;  %v115_v21 = vrot.slane %v64_v10, 4  ;;  %s455_s1 = sshll.u32 %s601_s0, 4  ;;  %s456_s1 = int_to_ptr.vmem [resolvable:$true] %s455_s1 }
  0x10   :  { %v104_v20 = vmax.f32 %v62_v5, %v103_v13  ;;  %v75_v22 = vrot.slane %v74_v14, 2  ;;  %v81_v23 = vrot.slane %v80_v15, 2  ;;  %v110_v25 = vmax.f32 %v63_v9, %v109_v17 }
  0x11   :  { %v87_v24 = vrot.slane %v86_v16, 2  ;;  %v93_v26 = vrot.slane %v92_v18, 2  ;;  %v99_v27 = vrot.slane %v98_v19, 2  ;;  %v116_v29 = vmax.f32 %v64_v10, %v115_v21 }
  0x12   :  { %v105_v28 = vrot.slane %v104_v20, 2  ;;  %v76_v30 = vmax.f32 %v74_v14, %v75_v22  ;;  %v82_v31 = vmax.f32 %v80_v15, %v81_v23  ;;  %v111_v33 = vrot.slane %v110_v25, 2 }
  0x13   :  { %v88_v32 = vmax.f32 %v86_v16, %v87_v24  ;;  %v94_v34 = vmax.f32 %v92_v18, %v93_v26  ;;  %v100_v35 = vmax.f32 %v98_v19, %v99_v27  ;;  %v117_v37 = vrot.slane %v116_v29, 2 }
  0x14   :  { %v106_v36 = vmax.f32 %v104_v20, %v105_v28  ;;  %v77_v38 = vrot.slane %v76_v30, 1  ;;  %v83_v39 = vrot.slane %v82_v31, 1  ;;  %v112_v41 = vmax.f32 %v110_v25, %v111_v33 }
  0x15   :  { %v89_v40 = vrot.slane %v88_v32, 1  ;;  %v95_v42 = vrot.slane %v94_v34, 1  ;;  %v101_v43 = vrot.slane %v100_v35, 1  ;;  %v118_v45 = vmax.f32 %v116_v29, %v117_v37 }
  0x16   :  { %v107_v44 = vrot.slane %v106_v36, 1  ;;  %v78_v46 = vmax.f32 %v76_v30, %v77_v38  ;;  %v84_v47 = vmax.f32 %v82_v31, %v83_v39  ;;  %v113_v49 = vrot.slane %v112_v41, 1 }
  0x17   :  { %v90_v48 = vmax.f32 %v88_v32, %v89_v40  ;;  %v96_v50 = vmax.f32 %v94_v34, %v95_v42  ;;  %v102_v51 = vmax.f32 %v100_v35, %v101_v43  ;;  %v119_v53 = vrot.slane %v118_v45, 1 }
  0x18   :  { %v108_v52 = vmax.f32 %v106_v36, %v107_v44  ;;  %v114_v54 = vmax.f32 %v112_v41, %v113_v49  ;;  %v623_v55 = vsub.f32 %v57_v0, %v78_v46  ;;  %v625_v56 = vsub.f32 %v58_v1, %v84_v47 }
  0x19   :  { %v627_v57 = vsub.f32 %v59_v2, %v90_v48  ;;  %v120_v58 = vmax.f32 %v118_v45, %v119_v53  ;;  %v629_v59 = vsub.f32 %v60_v3, %v96_v50  ;;  %v631_v60 = vsub.f32 %v61_v4, %v102_v51 }
  0x1a   :  { %v633_v61 = vsub.f32 %v62_v5, %v108_v52  ;;  %v635_v62 = vsub.f32 %v63_v9, %v114_v54  ;;  %v129_v63 = vmul.f32 1.442695, %v623_v55  ;;  %v131_v6 = vmul.f32 1.442695, %v625_v56 }
  0x1b   :  { %v133_v0 = vmul.f32 1.442695, %v627_v57  ;;  %v640_v7 = vsub.f32 %v64_v10, %v120_v58  ;;  %v135_v1 = vmul.f32 1.442695, %v629_v59  ;;  %v137_v2 = vmul.f32 1.442695, %v631_v60 }
  0x1c   :  { %473 = vpow2.f32 %v129_v63  ;;  %v139_v3 = vmul.f32 1.442695, %v633_v61  ;;  %v141_v4 = vmul.f32 1.442695, %v635_v62  ;;  %vm391_vm3 = vcmask 1044484  }
  0x1d   :  { %475 = vpow2.f32 %v131_v6  ;;  %v143_v5 = vmul.f32 1.442695, %v640_v7  ;;  %vm393_vm4 = vcmask 1046534   ;;  %vm395_vm5 = vcmask 1045508  }
  0x1e   :  { %477 = vpow2.f32 %v133_v0  ;;  %vm397_vm6 = vcmask 1043456  }
  0x1f   :  { %479 = vpow2.f32 %v135_v1 }
  0x20   :  { %481 = vpow2.f32 %v137_v2 }
  0x21   :  { %483 = vpow2.f32 %v139_v3 }
  0x22   :  { %v647_v8 = vpop.eup %473  ;;  %485 = vpow2.f32 %v141_v4 }
  0x23   :  { %v649_v9 = vpop.eup %475  ;;  %487 = vpow2.f32 %v143_v5  ;;  %v145_v10 = vrot.slane %v647_v8, 4 }
  0x24   :  { %v652_v11 = vpop.eup %477  ;;  %v151_v12 = vrot.slane %v649_v9, 4 }
  0x25   :  { %v655_v13 = vpop.eup %479  ;;  %v146_v14 = vadd.f32 %v647_v8, %v145_v10  ;;  %v157_v15 = vrot.slane %v652_v11, 4 }
  0x26   :  { %v659_v16 = vpop.eup %481  ;;  %v152_v17 = vadd.f32 %v649_v9, %v151_v12  ;;  %v163_v18 = vrot.slane %v655_v13, 4 }
  0x27   :  { %v663_v19 = vpop.eup %483  ;;  %v147_v20 = vrot.slane %v146_v14, 2  ;;  %v158_v21 = vadd.f32 %v652_v11, %v157_v15  ;;  %v169_v22 = vrot.slane %v659_v16, 4 }
  0x28   :  { %v667_v23 = vpop.eup %485  ;;  %v153_v24 = vrot.slane %v152_v17, 2  ;;  %v164_v25 = vadd.f32 %v655_v13, %v163_v18  ;;  %v175_v26 = vrot.slane %v663_v19, 4 }
  0x29   :  { %v671_v27 = vpop.eup %487  ;;  %v148_v28 = vadd.f32 %v147_v20, %v146_v14  ;;  %v159_v29 = vrot.slane %v158_v21, 2  ;;  %v170_v30 = vadd.f32 %v659_v16, %v169_v22  ;;  %v181_v31 = vrot.slane %v667_v23, 4 }
  0x2a   :  { %v154_v32 = vadd.f32 %v153_v24, %v152_v17  ;;  %v165_v33 = vrot.slane %v164_v25, 2  ;;  %v176_v34 = vadd.f32 %v663_v19, %v175_v26  ;;  %v187_v35 = vrot.slane %v671_v27, 4  ;;  %v65_v17 = vld [vmem:[#allocation6] sm:$0xff]  ;;  %v67_v26 = vld [vmem:[#allocation6 + $0x10] sm:$0xff] }
  0x2b   :  { %v149_v36 = vrot.slane %v148_v28, 1  ;;  %v160_v37 = vadd.f32 %v159_v29, %v158_v21  ;;  %v171_v38 = vrot.slane %v170_v30, 2  ;;  %v182_v39 = vadd.f32 %v667_v23, %v181_v31  ;;  %v66_v21 = vld [vmem:[#allocation6 + $0x8] sm:$0xff]  ;;  %v68_v31 = vld [vmem:[#allocation6 + $0x18] sm:$0xff] }
  0x2c   :  { %v155_v40 = vrot.slane %v154_v32, 1  ;;  %v166_v41 = vadd.f32 %v165_v33, %v164_v25  ;;  %v177_v42 = vrot.slane %v176_v34, 2  ;;  %v188_v43 = vadd.f32 %v671_v27, %v187_v35 }
  0x2d   :  { %v679_v44 = vadd.f32 %v149_v36, %v148_v28  ;;  %v161_v45 = vrot.slane %v160_v37, 1  ;;  %v172_v46 = vadd.f32 %v171_v38, %v170_v30  ;;  %v183_v47 = vrot.slane %v182_v39, 2  ;;  %v69_v36 = vld [vmem:[#allocation6 + $0x20] sm:$0xff] }
  0x2e   :  { %v681_v48 = vadd.f32 %v155_v40, %v154_v32  ;;  %v167_v49 = vrot.slane %v166_v41, 1  ;;  %v178_v50 = vadd.f32 %v177_v42, %v176_v34  ;;  %v189_v51 = vrot.slane %v188_v43, 2 }
  0x2f   :  { %v683_v52 = vadd.f32 %v161_v45, %v160_v37  ;;  %v173_v53 = vrot.slane %v172_v46, 1  ;;  %v184_v54 = vadd.f32 %v183_v47, %v182_v39  ;;  %489 = vlog2.f32 %v679_v44 }
  0x30   :  { %v686_v58 = vadd.f32 %v167_v49, %v166_v41  ;;  %v179_v63 = vrot.slane %v178_v50, 1  ;;  %v190_v6 = vadd.f32 %v189_v51, %v188_v43  ;;  %491 = vlog2.f32 %v681_v48  ;;  %v70_v41 = vld [vmem:[#allocation6 + $0x28] sm:$0xff] }
  0x31   :  { %v689_v0 = vadd.f32 %v173_v53, %v172_v46  ;;  %v185_v1 = vrot.slane %v184_v54, 1  ;;  %493 = vlog2.f32 %v683_v52 }
  0x32   :  { %v692_v2 = vadd.f32 %v179_v63, %v178_v50  ;;  %v191_v3 = vrot.slane %v190_v6, 1  ;;  %495 = vlog2.f32 %v686_v58  ;;  %v72_v50 = vld [vmem:[#allocation6 + $0x38] sm:$0xff] }
  0x33   :  { %v695_v4 = vadd.f32 %v185_v1, %v184_v54  ;;  %497 = vlog2.f32 %v689_v0 }
  0x34   :  { %v698_v5 = vadd.f32 %v191_v3, %v190_v6  ;;  %499 = vlog2.f32 %v692_v2 }
  0x35   :  { %v490_v10 = vpop.eup %489  ;;  %501 = vlog2.f32 %v695_v4 }
  0x36   :  { %v492_v12 = vpop.eup %491  ;;  %v194_v14 = vmul.f32 0.6931472, %v490_v10  ;;  %503 = vlog2.f32 %v698_v5 }
  0x37   :  { %v494_v15 = vpop.eup %493  ;;  %v196_v18 = vmul.f32 0.6931472, %v492_v12  ;;  %505 = vrcp.f32 %v679_v44 }
  0x38   :  { %v496_v20 = vpop.eup %495  ;;  %v198_v22 = vmul.f32 0.6931472, %v494_v15  ;;  %v209_v24 = vsub.f32 %v623_v55, %v194_v14  ;;  %507 = vrcp.f32 %v681_v48 }
  0x39   :  { %v498_v25 = vpop.eup %497  ;;  %v200_v28 = vmul.f32 0.6931472, %v496_v20  ;;  %v210_v29 = vsub.f32 %v625_v56, %v196_v18  ;;  %v71_v56 = vld [vmem:[#allocation6 + $0x30] sm:$0xff]  ;;  %509 = vrcp.f32 %v683_v52 }
  0x3a   :  { %v500_v30 = vpop.eup %499  ;;  %v202_v32 = vmul.f32 0.6931472, %v498_v25  ;;  %v211_v33 = vsub.f32 %v627_v57, %v198_v22  ;;  %v217_v34 = vmul.f32 %v209_v24, %v65_v17  ;;  %511 = vrcp.f32 %v686_v58 }
  0x3b   :  { %v502_v35 = vpop.eup %501  ;;  %v204_v37 = vmul.f32 0.6931472, %v500_v30  ;;  %v212_v38 = vsub.f32 %v629_v59, %v200_v28  ;;  %v218_v39 = vmul.f32 %v210_v29, %v66_v21  ;;  %513 = vrcp.f32 %v689_v0 }
  0x3c   :  { %v504_v40 = vpop.eup %503  ;;  %v206_v55 = vmul.f32 0.6931472, %v502_v35  ;;  %v213_v42 = vsub.f32 %v631_v60, %v202_v32  ;;  %v219_v43 = vmul.f32 %v211_v33, %v67_v26  ;;  %v225_v45 = vrot.slane %v217_v34, 4 }
  0x3d   :  { %v208_v46 = vmul.f32 0.6931472, %v504_v40  ;;  %v214_v47 = vsub.f32 %v633_v61, %v204_v37  ;;  %v220_v49 = vmul.f32 %v212_v38, %v68_v31  ;;  %v231_v57 = vrot.slane %v218_v39, 4 }
  0x3e   :  { %v215_v51 = vsub.f32 %v635_v62, %v206_v55  ;;  %v221_v53 = vmul.f32 %v213_v42, %v69_v36  ;;  %v226_v54 = vadd.f32 %v225_v45, %v217_v34  ;;  %v237_v59 = vrot.slane %v219_v43, 4 }
  0x3f   :  { %v216_v63 = vsub.f32 %v640_v7, %v208_v46  ;;  %v222_v6 = vmul.f32 %v214_v47, %v70_v41  ;;  %v232_v1 = vadd.f32 %v231_v57, %v218_v39  ;;  %v243_v3 = vrot.slane %v220_v49, 4  ;;  %v730_v46 = vpop.eup %505 }
  0x40   :  { %v223_v60 = vmul.f32 %v215_v51, %v71_v56  ;;  %v227_v10 = vrot.slane %v226_v54, 2  ;;  %v238_v12 = vadd.f32 %v237_v59, %v219_v43  ;;  %v249_v14 = vrot.slane %v221_v53, 4 }
  0x41   :  { %v224_v15 = vmul.f32 %v216_v63, %v72_v50  ;;  %v233_v17 = vrot.slane %v232_v1, 2  ;;  %v244_v61 = vadd.f32 %v243_v3, %v220_v49  ;;  %v255_v18 = vrot.slane %v222_v6, 4 }
  0x42   :  { %v228_v20 = vadd.f32 %v227_v10, %v226_v54  ;;  %v239_v21 = vrot.slane %v238_v12, 2  ;;  %v250_v22 = vadd.f32 %v249_v14, %v221_v53  ;;  %v261_v25 = vrot.slane %v223_v60, 4 }
  0x43   :  { %v245_v62 = vrot.slane %v244_v61, 2  ;;  %v256_v26 = vadd.f32 %v255_v18, %v222_v6  ;;  %v711_v30 = vadd.f32 %v233_v17, %v232_v1  ;;  %v267_v7 = vrot.slane %v224_v15, 4 }
  0x44   :  { %v229_v28 = vrot.slane %v228_v20, 1  ;;  %v714_v31 = vadd.f32 %v239_v21, %v238_v12  ;;  %v251_v32 = vrot.slane %v250_v22, 2  ;;  %v262_v35 = vadd.f32 %v261_v25, %v223_v60 }
  0x45   :  { %v717_v34 = vadd.f32 %v245_v62, %v244_v61  ;;  %v257_v36 = vrot.slane %v256_v26, 2  ;;  %v273_v37 = vmul.f32 %v647_v8, %v209_v24  ;;  %v274_v39 = vmul.f32 %v649_v9, %v210_v29  ;;  %v735_v29 = vpop.eup %507 }
  0x46   :  { %v275_v40 = vmul.f32 %v652_v11, %v211_v33  ;;  %v723_v41 = vadd.f32 %v229_v28, %v228_v20  ;;  %v235_v44 = vrot.slane %v711_v30, 1  ;;  %v268_v55 = vadd.f32 %v267_v7, %v224_v15  ;;  %v737_v57 = vpop.eup %509 }
  0x47   :  { %v276_v43 = vmul.f32 %v655_v13, %v212_v38  ;;  %v241_v48 = vrot.slane %v714_v31, 1  ;;  %v252_v45 = vadd.f32 %v251_v32, %v250_v22  ;;  %v277_v56 = vmul.f32 %v659_v16, %v213_v42 }
  0x48   :  { %v278_v52 = vmul.f32 %v663_v19, %v214_v47  ;;  %v247_v8 = vrot.slane %v717_v34, 1  ;;  %v263_v9 = vrot.slane %v262_v35, 2  ;;  %v279_v11 = vmul.f32 %v667_v23, %v215_v51 }
  0x49   :  { %v280_v24 = vmul.f32 %v671_v27, %v216_v63  ;;  %v258_v33 = vadd.f32 %v257_v36, %v256_v26  ;;  %v281_v13 = vrot.slane %v273_v37, 4  ;;  %v287_v38 = vrot.slane %v274_v39, 4 }
  0x4a   :  { %v293_v49 = vrot.slane %v275_v40, 4  ;;  %v269_v16 = vrot.slane %v268_v55, 2  ;;  %v299_v42 = vrot.slane %v276_v43, 4  ;;  %v305_v19 = vrot.slane %v277_v56, 4 }
  0x4b   :  { %v311_v47 = vrot.slane %v278_v52, 4  ;;  %v282_v50 = vadd.f32 %v281_v13, %v273_v37  ;;  %v288_v53 = vadd.f32 %v287_v38, %v274_v39  ;;  %v317_v59 = vrot.slane %v279_v11, 4 }
  0x4c   :  { %v294_v54 = vadd.f32 %v293_v49, %v275_v40  ;;  %v300_v6 = vadd.f32 %v299_v42, %v276_v43  ;;  %v306_v23 = vadd.f32 %v305_v19, %v277_v56  ;;  %v323_v27 = vrot.slane %v280_v24, 4 }
  0x4d   :  { %v312_v51 = vadd.f32 %v311_v47, %v278_v52  ;;  %v283_v63 = vrot.slane %v282_v50, 2  ;;  %v289_v1 = vrot.slane %v288_v53, 2  ;;  %v318_v60 = vadd.f32 %v317_v59, %v279_v11 }
  0x4e   :  { %v295_v3 = vrot.slane %v294_v54, 2  ;;  %v301_v10 = vrot.slane %v300_v6, 2  ;;  %v307_v12 = vrot.slane %v306_v23, 2  ;;  %v324_v15 = vadd.f32 %v323_v27, %v280_v24 }
  0x4f   :  { %v313_v14 = vrot.slane %v312_v51, 2  ;;  %v284_v17 = vadd.f32 %v283_v63, %v282_v50  ;;  %v290_v61 = vadd.f32 %v289_v1, %v288_v53  ;;  %v319_v20 = vrot.slane %v318_v60, 2 }
  0x50   :  { %v296_v18 = vadd.f32 %v295_v3, %v294_v54  ;;  %v253_v21 = vrot.slane %v252_v45, 1  ;;  %v264_v22 = vadd.f32 %v263_v9, %v262_v35  ;;  %v302_v62 = vadd.f32 %v301_v10, %v300_v6  ;;  %v512_v54 = vpop.eup %511 }
  0x51   :  { %v325_v25 = vrot.slane %v324_v15, 2  ;;  %v285_v26 = vrot.slane %v284_v17, 1  ;;  %v291_v28 = vrot.slane %v290_v61, 1  ;;  %v308_v32 = vadd.f32 %v307_v12, %v306_v23  ;;  %v514_v23 = vpop.eup %513 }
  0x52   :  { %v297_v7 = vrot.slane %v296_v18, 1  ;;  %v236_v36 = vadd.f32 %v235_v44, %v711_v30  ;;  %v259_v37 = vrot.slane %v258_v33, 1  ;;  %v270_v39 = vadd.f32 %v269_v16, %v268_v55 }
  0x53   :  { %v314_v40 = vadd.f32 %v313_v14, %v312_v51  ;;  %v242_v43 = vadd.f32 %v241_v48, %v714_v31  ;;  %v303_v56 = vrot.slane %v302_v62, 1  ;;  %v320_v52 = vadd.f32 %v319_v20, %v318_v60 }
  0x54   :  { %v326_v11 = vadd.f32 %v325_v25, %v324_v15  ;;  %v248_v24 = vadd.f32 %v247_v8, %v717_v34  ;;  %v254_v13 = vadd.f32 %v253_v21, %v252_v45  ;;  %v286_v35 = vadd.f32 %v285_v26, %v284_v17 }
  0x55   :  { %v292_v9 = vadd.f32 %v291_v28, %v290_v61  ;;  %v265_v38 = vrot.slane %v264_v22, 1  ;;  %v298_v49 = vadd.f32 %v297_v7, %v296_v18  ;;  %v309_v42 = vrot.slane %v308_v32, 1 }
  0x56   :  { %v260_v19 = vadd.f32 %v259_v37, %v258_v33  ;;  %v271_v30 = vrot.slane %v270_v39, 1  ;;  %v315_v44 = vrot.slane %v314_v40, 1  ;;  %v304_v55 = vadd.f32 %v303_v56, %v302_v62 }
  0x57   :  { %v321_v31 = vrot.slane %v320_v52, 1  ;;  %v327_v48 = vrot.slane %v326_v11, 1  ;;  %515 = vrcp.f32 %v692_v2  ;;  %v338_v34 = vmul.f32 0.95, %v236_v36 }
  0x58   :  { %517 = vrcp.f32 %v695_v4  ;;  %v345_v45 = vmul.f32 %v730_v46, %v286_v35  ;;  %v346_v8 = vmul.f32 %v735_v29, %v292_v9  ;;  %v310_v16 = vadd.f32 %v309_v42, %v308_v32 }
  0x59   :  { %519 = vrcp.f32 %v698_v5  ;;  %v339_v58 = vmul.f32 0.95, %v242_v43  ;;  %v347_v33 = vmul.f32 %v737_v57, %v298_v49  ;;  %v266_v47 = vadd.f32 %v265_v38, %v264_v22 }
  0x5a   :  { %v272_v0 = vadd.f32 %v271_v30, %v270_v39  ;;  %v316_v50 = vadd.f32 %v315_v44, %v314_v40  ;;  %v354_v53 = vmul.f32 0.05, %v346_v8  ;;  %v322_v59 = vadd.f32 %v321_v31, %v320_v52 }
  0x5b   :  { %v337_v2 = vmul.f32 0.95, %v723_v41  ;;  %v353_v4 = vmul.f32 0.05, %v345_v45  ;;  %v355_v6 = vmul.f32 0.05, %v347_v33  ;;  %v328_v46 = vadd.f32 %v327_v48, %v326_v11 }
  0x5c   :  { %v340_v51 = vmul.f32 0.95, %v248_v24  ;;  %v348_v29 = vmul.f32 %v512_v54, %v304_v55  ;;  %v362_v27 = vadd.f32 %v354_v53, %v338_v34  ;;  %v341_v5 = vmul.f32 0.95, %v254_v13 }
  0x5d   :  { %v516_v63 = vpop.eup %515  ;;  %v342_v1 = vmul.f32 0.95, %v260_v19  ;;  %v349_v3 = vmul.f32 %v514_v23, %v310_v16  ;;  %v363_v57 = vadd.f32 %v355_v6, %v339_v58  ;;  %v343_v10 = vmul.f32 0.95, %v266_v47 }
  0x5e   :  { %v518_v60 = vpop.eup %517  ;;  %v344_v12 = vmul.f32 0.95, %v272_v0  ;;  %v350_v14 = vmul.f32 %v516_v63, %v316_v50  ;;  %v356_v15 = vmul.f32 0.05, %v348_v29  ;;  %v361_v18 = vadd.f32 %v353_v4, %v337_v2 }
  0x5f   :  { %v520_v17 = vpop.eup %519  ;;  %v351_v61 = vmul.f32 %v518_v60, %v322_v59  ;;  %v357_v41 = vmul.f32 0.05, %v349_v3  ;;  %v378_v20 = vrot.slane %v362_v27, 7  ;;  %v379_v25 = vrot.slane %v363_v57, 6 }
  0x60   :  { %v352_v21 = vmul.f32 %v520_v17, %v328_v46  ;;  %v358_v22 = vmul.f32 0.05, %v350_v14  ;;  %v364_v62 = vadd.f32 %v356_v15, %v340_v51 }
  0x61   :  { %v359_v26 = vmul.f32 0.05, %v351_v61  ;;  %v365_v28 = vadd.f32 %v357_v41, %v341_v5  ;;  %v386_v56 = vsel %vm385_vm0, %v361_v18, %v378_v20 }
  0x62   :  { %v360_v7 = vmul.f32 0.05, %v352_v21  ;;  %v366_v32 = vadd.f32 %v358_v22, %v342_v1  ;;  %v380_v36 = vrot.slane %v364_v62, 5 }
  0x63   :  { %v367_v37 = vadd.f32 %v359_v26, %v343_v10  ;;  %v381_v39 = vrot.slane %v365_v28, 4 }
  0x64   :  { %v368_v40 = vadd.f32 %v360_v7, %v344_v12  ;;  %v382_v43 = vrot.slane %v366_v32, 3  ;;  %v388_v52 = vsel %vm387_vm1, %v379_v25, %v380_v36 }
  0x65   :  { %v383_v11 = vrot.slane %v367_v37, 2  ;;  %v390_v35 = vsel %vm389_vm2, %v386_v56, %v388_v52 }
  0x66   :  { %v384_v24 = vrot.slane %v368_v40, 1  ;;  %v392_v13 = vsel %vm391_vm3, %v381_v39, %v382_v43 }
  0x68   :  { %v394_v9 = vsel %vm393_vm4, %v383_v11, %v384_v24 }
  0x69   :  { %v396_v38 = vsel %vm395_vm5, %v392_v13, %v394_v9 }
  0x6a   :  { %v398_v49 = vsel %vm397_vm6, %v390_v35, %v396_v38 }
  0x6b   :  { %v407_v42 = vperm.slane %v398_v49, 0  ;;  %v408_v19 = vperm.slane %v398_v49, 1  ;;  %v409_v30 = vperm.slane %v398_v49, 2  ;;  %v410_v44 = vperm.slane %v398_v49, 3 }
  0x6c   :  { %v411_v55 = vperm.slane %v398_v49, 4  ;;  %v412_v8 = vperm.slane %v398_v49, 5  ;;  %v413_v33 = vperm.slane %v398_v49, 6  ;;  %v414_v50 = vperm.slane %v398_v49, 7 }
  0x6d   :  { %v423_v31 = vsel %vm385_vm0, %v407_v42, 0.0  ;;  %v424_v48 = vsel %vm385_vm0, %v408_v19, 0.0  ;;  %v426_v34 = vsel %vm385_vm0, %v409_v30, 0.0  ;;  %v428_v16 = vsel %vm385_vm0, %v410_v44, 0.0 }
  0x6e   :  { %v425_v45 = vadd.f32 %v424_v48, %v423_v31  ;;  %v430_v47 = vsel %vm385_vm0, %v411_v55, 0.0  ;;  %v432_v53 = vsel %vm385_vm0, %v412_v8, 0.0  ;;  %v434_v59 = vsel %vm385_vm0, %v413_v33, 0.0 }
  0x6f   :  { %v436_v4 = vsel %vm385_vm0, %v414_v50, 0.0 }
  0x70   :  { %v427_v58 = vadd.f32 %v426_v34, %v425_v45 }
  0x72   :  { %v429_v0 = vadd.f32 %v428_v16, %v427_v58 }
  0x74   :  { %v431_v54 = vadd.f32 %v430_v47, %v429_v0 }
  0x76   :  { %v433_v2 = vadd.f32 %v432_v53, %v431_v54 }
  0x78   :  { %v435_v6 = vadd.f32 %v434_v59, %v433_v2 }
  0x7a   :  { %v437_v23 = vadd.f32 %v436_v4, %v435_v6 }
  0x7c   :  { %438 = vadd.xlane.f32.xlu0 %v437_v23 }
  0xef   :  { %v439_v46 = vpop.xlane.xlu0 %438 }
  0xf0   :  { %v440_v51 = vrot.slane %v439_v46, 4 }
  0xf2   :  { %v441_v29 = vadd.f32 %v440_v51, %v439_v46 }
  0xf4   :  { %v442_v27 = vrot.slane %v441_v29, 2 }
  0xf6   :  { %v443_v63 = vadd.f32 %v442_v27, %v441_v29 }
  0xf8   :  { %v444_v5 = vrot.slane %v443_v63, 1 }
  0xfa   :  { %v445_v1 = vadd.f32 %v444_v5, %v443_v63 }
  0xfc   :  { %468 = vpush %v445_v1 }
 0x12d   :  { %s469_s22 = spop %468 }
 0x12e   :  { %s447_s23 = ssub.f32 0.0, %s469_s22 }
 0x130   :  { %v448_v3 = vstv %s447_s23 }
 0x131   :  { %449 = vst [vmem:[#allocation8] sm:$0xff] %v448_v3 }
 0x132   :  { %460 = dma.vmem_to_hbm [thread:$0]  %s456_s1, 128, %s458_s21, [#allocation5]  }
 0x133   :  { %597 = dma.done.wait [#allocation5], 128  }
 0x134   :  { %598 = vsyncadd [#allocation5], 4294967168 }
 0x135   :  { %465 = vsyncpa [#allocation4], 1 }
 0x136   :  { %466 = vsyncpa [#allocation7], 1 }
 0x137   :  { %467 = vsyncpa [#allocation5], 1 }

</bundles_post_ra>
